<compile_context>
chip_gen: v6e
topology: v6e:2x2x1
jax: 0.10.0
libtpu: 0.0.40
codegen_flags: <defaults>
</compile_context>

<pallas_src>
import functools

import jax
import jax.numpy as jnp
import numpy as np
from jax import lax
from jax.experimental import pallas as pl
from jax.experimental.pallas import tpu as pltpu


def _round_up(x, m):
    return ((x + m - 1) // m) * m


def _pad_2d(a, rows, cols):
    out = jnp.zeros((rows, cols), a.dtype)
    return out.at[: a.shape[0], : a.shape[1]].set(a)


# --------------------------------------------------------------------------
# Fused kernel: Tb recurrence steps + Linear-head epilogue per grid iteration.
# hfin_ref doubles as the cross-grid-step hidden-state carry (resident block).
# --------------------------------------------------------------------------
def _rnn_fused_kernel(x_ref, h0_ref, whh_ref, wout_ref, bout_ref,
                      logits_ref, hfin_ref, y_scr,
                      *, seq_len, time_block, batch_pad, needs_mask):
    g = pl.program_id(0)

    @pl.when(g == 0)
    def _():
        hfin_ref[...] = h0_ref[...]

    whh = whh_ref[...]                 # (Hp, Hp), loaded once per grid step
    h_init = hfin_ref[...]             # (Bp, Hp) f32, resident carry

    def step(i, h_prev):
        xb = x_ref[i]                  # (Bp, Hp) f32, bias already folded in
        acc = jnp.dot(h_prev.astype(whh.dtype), whh,
                      preferred_element_type=jnp.float32)
        h_new = jnp.tanh(xb + acc)
        row0 = pl.multiple_of(i * batch_pad, batch_pad)
        y_scr[pl.ds(row0, batch_pad), :] = h_new
        if needs_mask:
            t = g * time_block + i
            return jnp.where(t < seq_len, h_new, h_prev)   # freeze on padded steps
        return h_new

    h_last = lax.fori_loop(0, time_block, step, h_init, unroll=True)
    hfin_ref[...] = h_last

    # Head epilogue: (Tb*Bp, Hp) x (Hp, Vp) + bias, f32 accumulation.
    wout = wout_ref[...]
    y2 = y_scr[...].astype(wout.dtype)
    logits_ref[...] = (jnp.dot(y2, wout, preferred_element_type=jnp.float32)
                       + bout_ref[...])


# --------------------------------------------------------------------------
# Un-fused recurrence kernel (Y emitted as weight_dtype, lane-dense 2D slab).
# --------------------------------------------------------------------------
def _rnn_recurrence_kernel(x_ref, h0_ref, whh_ref, y_ref, hfin_ref,
                           *, seq_len, time_block, batch_pad, needs_mask):
    g = pl.program_id(0)

    @pl.when(g == 0)
    def _():
        hfin_ref[...] = h0_ref[...]

    whh = whh_ref[...]
    h_init = hfin_ref[...]

    def step(i, h_prev):
        xb = x_ref[i]
        acc = jnp.dot(h_prev.astype(whh.dtype), whh,
                      preferred_element_type=jnp.float32)
        h_new = jnp.tanh(xb + acc)
        row0 = pl.multiple_of(i * batch_pad, batch_pad)
        y_ref[pl.ds(row0, batch_pad), :] = h_new.astype(y_ref.dtype)
        if needs_mask:
            t = g * time_block + i
            return jnp.where(t < seq_len, h_new, h_prev)
        return h_new

    h_last = lax.fori_loop(0, time_block, step, h_init, unroll=True)
    hfin_ref[...] = h_last


# --------------------------------------------------------------------------
# Separate Linear-head kernel: (tm, Hp) x (Hp, tn) + bias, f32 accumulation.
# --------------------------------------------------------------------------
def _head_kernel(y_ref, w_ref, b_ref, o_ref):
    o_ref[...] = (jnp.dot(y_ref[...], w_ref[...],
                          preferred_element_type=jnp.float32) + b_ref[...])


def rnn_model_forward(inputs, state, params, *, weight_dtype=jnp.bfloat16,
                      time_block=32, fuse_head=None):
    """Pallas implementation of RNNModel.forward.

    inputs: (B, T) int32 token ids; state: (1, B, H) float32.
    Returns (output (T*B, V) float32, new_state (1, B, H) float32).
    """
    W_ih, W_hh, b_ih, b_hh, W_out, b_out = params
    H, V = W_ih.shape
    B, T = inputs.shape

    Bp = _round_up(B, 8)
    Hp = _round_up(H, 128)
    Vp = _round_up(V, 128)
    Tb = min(time_block, T)
    T_pad = _round_up(T, Tb)
    n_tblocks = T_pad // Tb
    needs_mask = (T_pad != T)

    wbytes = jnp.dtype(weight_dtype).itemsize
    if fuse_head is None:
        est = (2 * Tb * Bp * Hp * 4          # x blocks (double buffered)
               + Hp * Hp * wbytes            # W_hh^T
               + Hp * Vp * wbytes            # W_out^T
               + 2 * Tb * Bp * Vp * 4        # logits blocks (double buffered)
               + Tb * Bp * Hp * 4            # Y scratch
               + 4 * Bp * Hp * 4)            # hidden state bits
        fuse_head = est <= 20 * 1024 * 1024

    # Embedding gather (one-hot @ W_ih^T == row selection) done once in the wrapper,
    # with the combined bias pre-added; streamed into the kernel as (Tb, Bp, Hp) blocks.
    ids_tm = jnp.zeros((T_pad, Bp), jnp.int32).at[:T, :B].set(inputs.T)
    wih_rows = _pad_2d(W_ih.T.astype(jnp.float32), V, Hp)               # (V, Hp)
    b_comb = jnp.zeros((Hp,), jnp.float32).at[:H].set(b_ih + b_hh)
    x_all = (jnp.take(wih_rows, ids_tm.reshape(-1), axis=0)
             .reshape(T_pad, Bp, Hp) + b_comb[None, None, :])           # (T_pad, Bp, Hp) f32

    h0 = _pad_2d(state[0].astype(jnp.float32), Bp, Hp)                  # (Bp, Hp)
    whh_t = _pad_2d(W_hh.T, Hp, Hp).astype(weight_dtype)                # (Hp, Hp)
    wout_t = _pad_2d(W_out.T, Hp, Vp).astype(weight_dtype)              # (Hp, Vp)
    bout = jnp.zeros((1, Vp), jnp.float32).at[0, :V].set(b_out)

    cparams = pltpu.CompilerParams(
        dimension_semantics=("arbitrary",),        # sequential recurrence in time
        vmem_limit_bytes=32 * 1024 * 1024)

    if fuse_head:
        kernel = functools.partial(
            _rnn_fused_kernel, seq_len=T, time_block=Tb, batch_pad=Bp,
            needs_mask=needs_mask)
        logits_pad, h_fin = pl.pallas_call(
            kernel,
            out_shape=(
                jax.ShapeDtypeStruct((T_pad * Bp, Vp), jnp.float32),    # logits (padded)
                jax.ShapeDtypeStruct((Bp, Hp), jnp.float32),            # final hidden state
            ),
            grid_spec=pltpu.PrefetchScalarGridSpec(
                num_scalar_prefetch=0,
                grid=(n_tblocks,),
                in_specs=[
                    pl.BlockSpec((Tb, Bp, Hp), lambda g: (g, 0, 0)),    # x (+bias)
                    pl.BlockSpec((Bp, Hp), lambda g: (0, 0)),           # h0
                    pl.BlockSpec((Hp, Hp), lambda g: (0, 0)),           # W_hh^T
                    pl.BlockSpec((Hp, Vp), lambda g: (0, 0)),           # W_out^T
                    pl.BlockSpec((1, Vp), lambda g: (0, 0)),            # b_out
                ],
                out_specs=[
                    pl.BlockSpec((Tb * Bp, Vp), lambda g: (g, 0)),      # logits block
                    pl.BlockSpec((Bp, Hp), lambda g: (0, 0)),           # hidden carry
                ],
                scratch_shapes=[pltpu.VMEM((Tb * Bp, Hp), jnp.float32)],  # Y block
            ),
            compiler_params=cparams,
        )(x_all, h0, whh_t, wout_t, bout)
        output = (logits_pad.reshape(T_pad, Bp, Vp)[:T, :B, :V]
                  .reshape(T * B, V))
    else:
        kernel = functools.partial(
            _rnn_recurrence_kernel, seq_len=T, time_block=Tb, batch_pad=Bp,
            needs_mask=needs_mask)
        y_pad, h_fin = pl.pallas_call(
            kernel,
            out_shape=(
                jax.ShapeDtypeStruct((T_pad * Bp, Hp), weight_dtype),   # Y slab (2D, lane-dense)
                jax.ShapeDtypeStruct((Bp, Hp), jnp.float32),
            ),
            grid_spec=pltpu.PrefetchScalarGridSpec(
                num_scalar_prefetch=0,
                grid=(n_tblocks,),
                in_specs=[
                    pl.BlockSpec((Tb, Bp, Hp), lambda g: (g, 0, 0)),    # x (+bias)
                    pl.BlockSpec((Bp, Hp), lambda g: (0, 0)),           # h0
                    pl.BlockSpec((Hp, Hp), lambda g: (0, 0)),           # W_hh^T
                ],
                out_specs=[
                    pl.BlockSpec((Tb * Bp, Hp), lambda g: (g, 0)),      # Y block
                    pl.BlockSpec((Bp, Hp), lambda g: (0, 0)),           # hidden carry
                ],
            ),
            compiler_params=cparams,
        )(x_all, h0, whh_t)

        Mp = T_pad * Bp
        tm = next((c for c in (512, 256, 128) if Mp % c == 0), Mp)
        tn = 256 if Vp % 256 == 0 else 128                               # 256-wide MXU on v6e/v7x

        logits_pad = pl.pallas_call(
            _head_kernel,
            out_shape=jax.ShapeDtypeStruct((Mp, Vp), jnp.float32),
            grid_spec=pltpu.PrefetchScalarGridSpec(
                num_scalar_prefetch=0,
                grid=(Mp // tm, Vp // tn),
                in_specs=[
                    pl.BlockSpec((tm, Hp), lambda i, j: (i, 0)),         # Y rows (weight_dtype)
                    pl.BlockSpec((Hp, tn), lambda i, j: (0, j)),         # W_out^T columns
                    pl.BlockSpec((1, tn), lambda i, j: (0, j)),          # b_out slice
                ],
                out_specs=pl.BlockSpec((tm, tn), lambda i, j: (i, j)),
            ),
            compiler_params=pltpu.CompilerParams(
                dimension_semantics=("parallel", "parallel"),
                vmem_limit_bytes=32 * 1024 * 1024,
            ),
        )(y_pad, wout_t, bout)
        output = (logits_pad.reshape(T_pad, Bp, Vp)[:T, :B, :V]
                  .reshape(T * B, V))

    new_state = h_fin[:B, :H][None]
    return output, new_state


def _reference_forward(inputs, state, params):
    """Pure-JAX f32 reference mirroring the PyTorch forward semantics."""
    W_ih, W_hh, b_ih, b_hh, W_out, b_out = params
    V = W_ih.shape[1]
    X = jax.nn.one_hot(inputs.T, V, dtype=jnp.float32)    # (T, B, V)
    h = state[0]
    ys = []
    for t in range(X.shape[0]):
        h = jnp.tanh(X[t] @ W_ih.T + b_ih + h @ W_hh.T + b_hh)
        ys.append(h)
    Y = jnp.stack(ys, axis=0)                              # (T, B, H)
    out = Y.reshape(-1, Y.shape[-1]) @ W_out.T + b_out     # (T*B, V)
    return out, h[None]


if __name__ == "__main__":
    # Small synthetic config: vocab=32, hidden=32, batch=4, seq=8.
    vocab_size = 32
    num_hiddens = 32
    batch = 4
    seq = 8

    key = jax.random.PRNGKey(0)
    k = jax.random.split(key, 8)
    scale = 1.0 / np.sqrt(num_hiddens)

    # PyTorch nn.RNN / nn.Linear default init: U(-1/sqrt(H), 1/sqrt(H)).
    W_ih = jax.random.uniform(k[0], (num_hiddens, vocab_size), jnp.float32, -scale, scale)
    W_hh = jax.random.uniform(k[1], (num_hiddens, num_hiddens), jnp.float32, -scale, scale)
    b_ih = jax.random.uniform(k[2], (num_hiddens,), jnp.float32, -scale, scale)
    b_hh = jax.random.uniform(k[3], (num_hiddens,), jnp.float32, -scale, scale)
    W_out = jax.random.uniform(k[4], (vocab_size, num_hiddens), jnp.float32, -scale, scale)
    b_out = jax.random.uniform(k[5], (vocab_size,), jnp.float32, -scale, scale)
    params = (W_ih, W_hh, b_ih, b_hh, W_out, b_out)

    inputs = jax.random.randint(k[6], (batch, seq), 0, vocab_size, dtype=jnp.int32)
    # begin_state: zeros of shape (num_directions * num_layers, batch, hidden)
    state = jnp.zeros((1, batch, num_hiddens), jnp.float32)

    ref_out, ref_state = _reference_forward(inputs, state, params)

    def check(out, st, rtol, atol):
        jax.block_until_ready((out, st))
        np.testing.assert_allclose(np.asarray(out), np.asarray(ref_out), rtol=rtol, atol=atol)
        np.testing.assert_allclose(np.asarray(st), np.asarray(ref_state), rtol=rtol, atol=atol)

    # 1) fused head (auto-selected at this size), f32 weights: tight check.
    out, st = rnn_model_forward(inputs, state, params, weight_dtype=jnp.float32)
    check(out, st, 1e-4, 1e-4)
    assert out.shape == (seq * batch, vocab_size)
    assert st.shape == (1, batch, num_hiddens)

    # 2) fused, f32, time_block=3: exercises time padding/masking + multi-block hidden carry.
    out, st = rnn_model_forward(inputs, state, params, weight_dtype=jnp.float32, time_block=3)
    check(out, st, 1e-4, 1e-4)

    # 3) un-fused path (separate tiled head kernel), f32: tight check.
    out, st = rnn_model_forward(inputs, state, params, weight_dtype=jnp.float32, fuse_head=False)
    check(out, st, 1e-4, 1e-4)

    # 4) default bf16 weights (fused): f32 accumulation / f32 hidden state, loose tolerance.
    out, st = rnn_model_forward(inputs, state, params)
    check(out, st, 3e-2, 3e-2)

    # 5) bf16 weights, un-fused (bf16 Y slab + separate head): loose tolerance.
    out, st = rnn_model_forward(inputs, state, params, fuse_head=False)
    check(out, st, 3e-2, 3e-2)

    print("KERNEL_OK")
</pallas_src>

<mosaic_0001>
module attributes {stable_mosaic.version = 11 : i64} {
  func.func @_rnn_fused_kernel(%arg0: i32, %arg1: memref<8x8x128xf32, #tpu.memory_space<vmem>>, %arg2: memref<8x128xf32, #tpu.memory_space<vmem>>, %arg3: memref<128x128xf32, #tpu.memory_space<vmem>>, %arg4: memref<128x128xf32, #tpu.memory_space<vmem>>, %arg5: memref<1x128xf32, #tpu.memory_space<vmem>>, %arg6: memref<64x128xf32, #tpu.memory_space<vmem>>, %arg7: memref<8x128xf32, #tpu.memory_space<vmem>>, %arg8: memref<64x128xf32, #tpu.memory_space<vmem>>) attributes {dimension_semantics = [#tpu.dimension_semantics<arbitrary>], iteration_bounds = array<i64: 1>, scalar_prefetch = 0 : i64, scratch_operands = 1 : i64, tpu.core_type = #tpu.core_type<tc>, window_params = [{transform_indices = @transform_0, window_bounds = array<i64: 8, 8, 128>}, {pipeline_mode = #tpu.pipeline_mode<synchronous>, transform_indices = @transform_1, window_bounds = array<i64: 8, 128>}, {pipeline_mode = #tpu.pipeline_mode<synchronous>, transform_indices = @transform_2, window_bounds = array<i64: 128, 128>}, {pipeline_mode = #tpu.pipeline_mode<synchronous>, transform_indices = @transform_3, window_bounds = array<i64: 128, 128>}, {pipeline_mode = #tpu.pipeline_mode<synchronous>, transform_indices = @transform_4, window_bounds = array<i64: 1, 128>}, {transform_indices = @transform_5, window_bounds = array<i64: 64, 128>}, {pipeline_mode = #tpu.pipeline_mode<synchronous>, transform_indices = @transform_6, window_bounds = array<i64: 8, 128>}]} {
    %c0_i32 = arith.constant 0 : i32
    %0 = arith.cmpi eq, %arg0, %c0_i32 : i32
    %1 = arith.extui %0 : i1 to i32
    %c0_i32_0 = arith.constant 0 : i32
    %2 = arith.cmpi ne, %1, %c0_i32_0 : i32
    scf.if %2 {
      %c0_55 = arith.constant 0 : index
      %c0_56 = arith.constant 0 : index
      %93 = vector.load %arg2[%c0_55, %c0_56] : memref<8x128xf32, #tpu.memory_space<vmem>>, vector<8x128xf32>
      %c0_57 = arith.constant 0 : index
      %c0_58 = arith.constant 0 : index
      %94 = vector.load %arg7[%c0_57, %c0_58] : memref<8x128xf32, #tpu.memory_space<vmem>>, vector<8x128xf32>
      tpu.vector_store %arg7[%c0_57, %c0_58], %93 {strides = array<i32>} : memref<8x128xf32, #tpu.memory_space<vmem>>, vector<8x128xf32>,
    } else {
    }
    %c0 = arith.constant 0 : index
    %c0_1 = arith.constant 0 : index
    %3 = vector.load %arg3[%c0, %c0_1] : memref<128x128xf32, #tpu.memory_space<vmem>>, vector<128x128xf32>
    %c0_2 = arith.constant 0 : index
    %c0_3 = arith.constant 0 : index
    %4 = vector.load %arg7[%c0_2, %c0_3] : memref<8x128xf32, #tpu.memory_space<vmem>>, vector<8x128xf32>
    %c0_i32_4 = arith.constant 0 : i32
    %5 = arith.index_cast %c0_i32_4 : i32 to index
    %c0_5 = arith.constant 0 : index
    %c0_6 = arith.constant 0 : index
    %6 = vector.load %arg1[%5, %c0_5, %c0_6] : memref<8x8x128xf32, #tpu.memory_space<vmem>>, vector<1x8x128xf32>
    %7 = vector.shape_cast %6 : vector<1x8x128xf32> to vector<8x128xf32>
    %cst = arith.constant dense<0.000000e+00> : vector<8x128xf32>
    %8 = tpu.matmul %4, %3, %cst {dimension_numbers = #tpu.dot_dimension_numbers<[1], [0], [0], [1], [0, 0, 1, 1], [], []>} : vector<8x128xf32>, vector<128x128xf32>, vector<8x128xf32> -> vector<8x128xf32>
    %9 = arith.addf %7, %8 : vector<8x128xf32>
    %10 = math.tanh %9 : vector<8x128xf32>
    %c8_i32 = arith.constant 8 : i32
    %11 = arith.muli %c0_i32_4, %c8_i32 : i32
    %12 = tpu.assume_multiple %11, 8 : i32
    %13 = arith.index_cast %12 : i32 to index
    %c0_7 = arith.constant 0 : index
    %14 = vector.load %arg8[%13, %c0_7] : memref<64x128xf32, #tpu.memory_space<vmem>>, vector<8x128xf32>
    tpu.vector_store %arg8[%13, %c0_7], %10 {strides = array<i32>} : memref<64x128xf32, #tpu.memory_space<vmem>>, vector<8x128xf32>,
    %c1_i32 = arith.constant 1 : i32
    %15 = arith.index_cast %c1_i32 : i32 to index
    %c0_8 = arith.constant 0 : index
    %c0_9 = arith.constant 0 : index
    %16 = vector.load %arg1[%15, %c0_8, %c0_9] : memref<8x8x128xf32, #tpu.memory_space<vmem>>, vector<1x8x128xf32>
    %17 = vector.shape_cast %16 : vector<1x8x128xf32> to vector<8x128xf32>
    %cst_10 = arith.constant dense<0.000000e+00> : vector<8x128xf32>
    %18 = tpu.matmul %10, %3, %cst_10 {dimension_numbers = #tpu.dot_dimension_numbers<[1], [0], [0], [1], [0, 0, 1, 1], [], []>} : vector<8x128xf32>, vector<128x128xf32>, vector<8x128xf32> -> vector<8x128xf32>
    %19 = arith.addf %17, %18 : vector<8x128xf32>
    %20 = math.tanh %19 : vector<8x128xf32>
    %c8_i32_11 = arith.constant 8 : i32
    %21 = arith.muli %c1_i32, %c8_i32_11 : i32
    %22 = tpu.assume_multiple %21, 8 : i32
    %23 = arith.index_cast %22 : i32 to index
    %c0_12 = arith.constant 0 : index
    %24 = vector.load %arg8[%23, %c0_12] : memref<64x128xf32, #tpu.memory_space<vmem>>, vector<8x128xf32>
    tpu.vector_store %arg8[%23, %c0_12], %20 {strides = array<i32>} : memref<64x128xf32, #tpu.memory_space<vmem>>, vector<8x128xf32>,
    %c2_i32 = arith.constant 2 : i32
    %25 = arith.index_cast %c2_i32 : i32 to index
    %c0_13 = arith.constant 0 : index
    %c0_14 = arith.constant 0 : index
    %26 = vector.load %arg1[%25, %c0_13, %c0_14] : memref<8x8x128xf32, #tpu.memory_space<vmem>>, vector<1x8x128xf32>
    %27 = vector.shape_cast %26 : vector<1x8x128xf32> to vector<8x128xf32>
    %cst_15 = arith.constant dense<0.000000e+00> : vector<8x128xf32>
    %28 = tpu.matmul %20, %3, %cst_15 {dimension_numbers = #tpu.dot_dimension_numbers<[1], [0], [0], [1], [0, 0, 1, 1], [], []>} : vector<8x128xf32>, vector<128x128xf32>, vector<8x128xf32> -> vector<8x128xf32>
    %29 = arith.addf %27, %28 : vector<8x128xf32>
    %30 = math.tanh %29 : vector<8x128xf32>
    %c8_i32_16 = arith.constant 8 : i32
    %31 = arith.muli %c2_i32, %c8_i32_16 : i32
    %32 = tpu.assume_multiple %31, 8 : i32
    %33 = arith.index_cast %32 : i32 to index
    %c0_17 = arith.constant 0 : index
    %34 = vector.load %arg8[%33, %c0_17] : memref<64x128xf32, #tpu.memory_space<vmem>>, vector<8x128xf32>
    tpu.vector_store %arg8[%33, %c0_17], %30 {strides = array<i32>} : memref<64x128xf32, #tpu.memory_space<vmem>>, vector<8x128xf32>,
    %c3_i32 = arith.constant 3 : i32
    %35 = arith.index_cast %c3_i32 : i32 to index
    %c0_18 = arith.constant 0 : index
    %c0_19 = arith.constant 0 : index
    %36 = vector.load %arg1[%35, %c0_18, %c0_19] : memref<8x8x128xf32, #tpu.memory_space<vmem>>, vector<1x8x128xf32>
    %37 = vector.shape_cast %36 : vector<1x8x128xf32> to vector<8x128xf32>
    %cst_20 = arith.constant dense<0.000000e+00> : vector<8x128xf32>
    %38 = tpu.matmul %30, %3, %cst_20 {dimension_numbers = #tpu.dot_dimension_numbers<[1], [0], [0], [1], [0, 0, 1, 1], [], []>} : vector<8x128xf32>, vector<128x128xf32>, vector<8x128xf32> -> vector<8x128xf32>
    %39 = arith.addf %37, %38 : vector<8x128xf32>
    %40 = math.tanh %39 : vector<8x128xf32>
    %c8_i32_21 = arith.constant 8 : i32
    %41 = arith.muli %c3_i32, %c8_i32_21 : i32
    %42 = tpu.assume_multiple %41, 8 : i32
    %43 = arith.index_cast %42 : i32 to index
    %c0_22 = arith.constant 0 : index
    %44 = vector.load %arg8[%43, %c0_22] : memref<64x128xf32, #tpu.memory_space<vmem>>, vector<8x128xf32>
    tpu.vector_store %arg8[%43, %c0_22], %40 {strides = array<i32>} : memref<64x128xf32, #tpu.memory_space<vmem>>, vector<8x128xf32>,
    %c4_i32 = arith.constant 4 : i32
    %45 = arith.index_cast %c4_i32 : i32 to index
    %c0_23 = arith.constant 0 : index
    %c0_24 = arith.constant 0 : index
    %46 = vector.load %arg1[%45, %c0_23, %c0_24] : memref<8x8x128xf32, #tpu.memory_space<vmem>>, vector<1x8x128xf32>
    %47 = vector.shape_cast %46 : vector<1x8x128xf32> to vector<8x128xf32>
    %cst_25 = arith.constant dense<0.000000e+00> : vector<8x128xf32>
    %48 = tpu.matmul %40, %3, %cst_25 {dimension_numbers = #tpu.dot_dimension_numbers<[1], [0], [0], [1], [0, 0, 1, 1], [], []>} : vector<8x128xf32>, vector<128x128xf32>, vector<8x128xf32> -> vector<8x128xf32>
    %49 = arith.addf %47, %48 : vector<8x128xf32>
    %50 = math.tanh %49 : vector<8x128xf32>
    %c8_i32_26 = arith.constant 8 : i32
    %51 = arith.muli %c4_i32, %c8_i32_26 : i32
    %52 = tpu.assume_multiple %51, 8 : i32
    %53 = arith.index_cast %52 : i32 to index
    %c0_27 = arith.constant 0 : index
    %54 = vector.load %arg8[%53, %c0_27] : memref<64x128xf32, #tpu.memory_space<vmem>>, vector<8x128xf32>
    tpu.vector_store %arg8[%53, %c0_27], %50 {strides = array<i32>} : memref<64x128xf32, #tpu.memory_space<vmem>>, vector<8x128xf32>,
    %c5_i32 = arith.constant 5 : i32
    %55 = arith.index_cast %c5_i32 : i32 to index
    %c0_28 = arith.constant 0 : index
    %c0_29 = arith.constant 0 : index
    %56 = vector.load %arg1[%55, %c0_28, %c0_29] : memref<8x8x128xf32, #tpu.memory_space<vmem>>, vector<1x8x128xf32>
    %57 = vector.shape_cast %56 : vector<1x8x128xf32> to vector<8x128xf32>
    %cst_30 = arith.constant dense<0.000000e+00> : vector<8x128xf32>
    %58 = tpu.matmul %50, %3, %cst_30 {dimension_numbers = #tpu.dot_dimension_numbers<[1], [0], [0], [1], [0, 0, 1, 1], [], []>} : vector<8x128xf32>, vector<128x128xf32>, vector<8x128xf32> -> vector<8x128xf32>
    %59 = arith.addf %57, %58 : vector<8x128xf32>
    %60 = math.tanh %59 : vector<8x128xf32>
    %c8_i32_31 = arith.constant 8 : i32
    %61 = arith.muli %c5_i32, %c8_i32_31 : i32
    %62 = tpu.assume_multiple %61, 8 : i32
    %63 = arith.index_cast %62 : i32 to index
    %c0_32 = arith.constant 0 : index
    %64 = vector.load %arg8[%63, %c0_32] : memref<64x128xf32, #tpu.memory_space<vmem>>, vector<8x128xf32>
    tpu.vector_store %arg8[%63, %c0_32], %60 {strides = array<i32>} : memref<64x128xf32, #tpu.memory_space<vmem>>, vector<8x128xf32>,
    %c6_i32 = arith.constant 6 : i32
    %65 = arith.index_cast %c6_i32 : i32 to index
    %c0_33 = arith.constant 0 : index
    %c0_34 = arith.constant 0 : index
    %66 = vector.load %arg1[%65, %c0_33, %c0_34] : memref<8x8x128xf32, #tpu.memory_space<vmem>>, vector<1x8x128xf32>
    %67 = vector.shape_cast %66 : vector<1x8x128xf32> to vector<8x128xf32>
    %cst_35 = arith.constant dense<0.000000e+00> : vector<8x128xf32>
    %68 = tpu.matmul %60, %3, %cst_35 {dimension_numbers = #tpu.dot_dimension_numbers<[1], [0], [0], [1], [0, 0, 1, 1], [], []>} : vector<8x128xf32>, vector<128x128xf32>, vector<8x128xf32> -> vector<8x128xf32>
    %69 = arith.addf %67, %68 : vector<8x128xf32>
    %70 = math.tanh %69 : vector<8x128xf32>
    %c8_i32_36 = arith.constant 8 : i32
    %71 = arith.muli %c6_i32, %c8_i32_36 : i32
    %72 = tpu.assume_multiple %71, 8 : i32
    %73 = arith.index_cast %72 : i32 to index
    %c0_37 = arith.constant 0 : index
    %74 = vector.load %arg8[%73, %c0_37] : memref<64x128xf32, #tpu.memory_space<vmem>>, vector<8x128xf32>
    tpu.vector_store %arg8[%73, %c0_37], %70 {strides = array<i32>} : memref<64x128xf32, #tpu.memory_space<vmem>>, vector<8x128xf32>,
    %c7_i32 = arith.constant 7 : i32
    %75 = arith.index_cast %c7_i32 : i32 to index
    %c0_38 = arith.constant 0 : index
    %c0_39 = arith.constant 0 : index
    %76 = vector.load %arg1[%75, %c0_38, %c0_39] : memref<8x8x128xf32, #tpu.memory_space<vmem>>, vector<1x8x128xf32>
    %77 = vector.shape_cast %76 : vector<1x8x128xf32> to vector<8x128xf32>
    %cst_40 = arith.constant dense<0.000000e+00> : vector<8x128xf32>
    %78 = tpu.matmul %70, %3, %cst_40 {dimension_numbers = #tpu.dot_dimension_numbers<[1], [0], [0], [1], [0, 0, 1, 1], [], []>} : vector<8x128xf32>, vector<128x128xf32>, vector<8x128xf32> -> vector<8x128xf32>
    %79 = arith.addf %77, %78 : vector<8x128xf32>
    %80 = math.tanh %79 : vector<8x128xf32>
    %c8_i32_41 = arith.constant 8 : i32
    %81 = arith.muli %c7_i32, %c8_i32_41 : i32
    %82 = tpu.assume_multiple %81, 8 : i32
    %83 = arith.index_cast %82 : i32 to index
    %c0_42 = arith.constant 0 : index
    %84 = vector.load %arg8[%83, %c0_42] : memref<64x128xf32, #tpu.memory_space<vmem>>, vector<8x128xf32>
    tpu.vector_store %arg8[%83, %c0_42], %80 {strides = array<i32>} : memref<64x128xf32, #tpu.memory_space<vmem>>, vector<8x128xf32>,
    %c8_i32_43 = arith.constant 8 : i32
    %c0_44 = arith.constant 0 : index
    %c0_45 = arith.constant 0 : index
    %85 = vector.load %arg7[%c0_44, %c0_45] : memref<8x128xf32, #tpu.memory_space<vmem>>, vector<8x128xf32>
    tpu.vector_store %arg7[%c0_44, %c0_45], %80 {strides = array<i32>} : memref<8x128xf32, #tpu.memory_space<vmem>>, vector<8x128xf32>,
    %c0_46 = arith.constant 0 : index
    %c0_47 = arith.constant 0 : index
    %86 = vector.load %arg4[%c0_46, %c0_47] : memref<128x128xf32, #tpu.memory_space<vmem>>, vector<128x128xf32>
    %c0_48 = arith.constant 0 : index
    %c0_49 = arith.constant 0 : index
    %87 = vector.load %arg8[%c0_48, %c0_49] : memref<64x128xf32, #tpu.memory_space<vmem>>, vector<64x128xf32>
    %cst_50 = arith.constant dense<0.000000e+00> : vector<64x128xf32>
    %88 = tpu.matmul %87, %86, %cst_50 {dimension_numbers = #tpu.dot_dimension_numbers<[1], [0], [0], [1], [0, 0, 1, 1], [], []>} : vector<64x128xf32>, vector<128x128xf32>, vector<64x128xf32> -> vector<64x128xf32>
    %c0_51 = arith.constant 0 : index
    %c0_52 = arith.constant 0 : index
    %89 = vector.load %arg5[%c0_51, %c0_52] : memref<1x128xf32, #tpu.memory_space<vmem>>, vector<1x128xf32>
    %90 = vector.broadcast %89 : vector<1x128xf32> to vector<64x128xf32>
    %91 = arith.addf %88, %90 : vector<64x128xf32>
    %c0_53 = arith.constant 0 : index
    %c0_54 = arith.constant 0 : index
    %92 = vector.load %arg6[%c0_53, %c0_54] : memref<64x128xf32, #tpu.memory_space<vmem>>, vector<64x128xf32>
    tpu.vector_store %arg6[%c0_53, %c0_54], %91 {strides = array<i32>} : memref<64x128xf32, #tpu.memory_space<vmem>>, vector<64x128xf32>,
    return
  }
  func.func @transform_0(%arg0: i32) -> (i32, i32, i32) {
    %c0_i32 = arith.constant 0 : i32
    %c0_i32_0 = arith.constant 0 : i32
    %c0_i32_1 = arith.constant 0 : i32
    return %arg0, %c0_i32, %c0_i32_0 : i32, i32, i32
  }
  func.func @transform_1(%arg0: i32) -> (i32, i32) {
    %c0_i32 = arith.constant 0 : i32
    %c0_i32_0 = arith.constant 0 : i32
    %c0_i32_1 = arith.constant 0 : i32
    return %c0_i32, %c0_i32_0 : i32, i32
  }
  func.func @transform_2(%arg0: i32) -> (i32, i32) {
    %c0_i32 = arith.constant 0 : i32
    %c0_i32_0 = arith.constant 0 : i32
    %c0_i32_1 = arith.constant 0 : i32
    return %c0_i32, %c0_i32_0 : i32, i32
  }
  func.func @transform_3(%arg0: i32) -> (i32, i32) {
    %c0_i32 = arith.constant 0 : i32
    %c0_i32_0 = arith.constant 0 : i32
    %c0_i32_1 = arith.constant 0 : i32
    return %c0_i32, %c0_i32_0 : i32, i32
  }
  func.func @transform_4(%arg0: i32) -> (i32, i32) {
    %c0_i32 = arith.constant 0 : i32
    %c0_i32_0 = arith.constant 0 : i32
    %c0_i32_1 = arith.constant 0 : i32
    return %c0_i32, %c0_i32_0 : i32, i32
  }
  func.func @transform_5(%arg0: i32) -> (i32, i32) {
    %c0_i32 = arith.constant 0 : i32
    %c0_i32_0 = arith.constant 0 : i32
    return %arg0, %c0_i32 : i32, i32
  }
  func.func @transform_6(%arg0: i32) -> (i32, i32) {
    %c0_i32 = arith.constant 0 : i32
    %c0_i32_0 = arith.constant 0 : i32
    %c0_i32_1 = arith.constant 0 : i32
    return %c0_i32, %c0_i32_0 : i32, i32
  }
}

</mosaic_0001>

<bundles_post_ra>
// kernel: tpu_custom_call.1
= control target key start
LH: loop header
LB: loop body
LE: loop exit
PB: predicated region body
PF: predicated region fallthrough
CT: control target
= control target key end

     0   :  { %12 = vsyncpa [#allocation4], 0  ;;  %s1927_s0 = inlined_call_operand.hbm [shape: f32[8,8,128], index: 0, kind: input, shape index: {}]   ;;  %s1928_s1 = inlined_call_operand.hbm [shape: f32[8,128], index: 1, kind: input, shape index: {}]   ;;  %s1929_s2 = inlined_call_operand.hbm [shape: f32[128,128], index: 2, kind: input, shape index: {}]   ;;  %s1930_s3 = inlined_call_operand.hbm [shape: f32[128,128], index: 3, kind: input, shape index: {}]   ;;  %s1931_s4 = inlined_call_operand.vmem [shape: f32[1,128], index: 4, kind: input, shape index: {}]   ;;  %s1932_s5 = inlined_call_operand.hbm [shape: f32[64,128], index: 5, kind: output, shape index: {0}]   ;;  %s1933_s6 = inlined_call_operand.hbm [shape: f32[8,128], index: 6, kind: output, shape index: {1}]  }
   0x1   :  { %13 = vsyncpa [#allocation7], 0 }
   0x2   :  { %14 = vsyncpa [#allocation10], 0 }
   0x3   :  { %15 = vsyncpa [#allocation5], 0 }
   0x4   :  { %16 = vsyncpa [#allocation13], 0  ;;  %s1525_s21 = smov [#allocation6]   ;;  %s1526_s23 = smov [#allocation3]  }
   0x5   :  { %s35_s22 = sshll.u32 %s1525_s21, 4  ;;  %s22_s24 = sshll.u32 %s1526_s23, 4  ;;  %s36_s22 = int_to_ptr.vmem [resolvable:$true] %s35_s22  ;;  %s23_s24 = int_to_ptr.vmem [resolvable:$true] %s22_s24 }
   0x6   :  { %s1403_s25 = scalar_lea.vmem %s36_s22, 128  ;;  %p1408_p1 = scmp.lt.s32.totalorder %s36_s22, %s36_s22 }
   0x7   :  { %p1404_p0 = scmp.ne.s32.totalorder %s36_s22, %s1403_s25  ;;  %p1409_p2 = scmp.lt.s32.totalorder %s1403_s25, %s1403_s25 }
   0x9   :  { %p1410_p3 = por %p1409_p2, %p1408_p1 }
   0xb   :  { %p1411_p4 = pnand %p1410_p3, %p1404_p0 }
   0xd   :  { %1414 = shalt.err (!%p1411_p4)
}
   0xe   :  { %38 = dma.hbm_to_vmem [thread:$0]  %s1928_s1, 128, %s36_s22, [#allocation7]  }
   0xf   :  { %s1423_s28 = scalar_lea.vmem %s23_s24, 1024  ;;  %p1428_p6 = scmp.lt.s32.totalorder %s23_s24, %s23_s24 }
  0x10   :  { %p1424_p5 = scmp.ne.s32.totalorder %s23_s24, %s1423_s28  ;;  %p1429_p7 = scmp.lt.s32.totalorder %s1423_s28, %s1423_s28 }
  0x12   :  { %p1430_p8 = por %p1429_p7, %p1428_p6 }
  0x14   :  { %p1431_p9 = pnand %p1430_p8, %p1424_p5 }
  0x16   :  { %1434 = shalt.err (!%p1431_p9)
}
  0x17   :  { %s1527_s29 = smov 128   ;;  %s1528_s30 = smov 8  }
  0x18   :  { %28 = dma.hbm_to_vmem [thread:$0]  %s1927_s0, 1024, %s23_s24, [#allocation4], %s1527_s29, %s1527_s29, %s1528_s30  }
  0x19   :  { %s1529_s9 = smov [#allocation8]   ;;  %s1530_s11 = smov [#allocation9]  }
  0x1a   :  { %s44_s10 = sshll.u32 %s1529_s9, 4  ;;  %s56_s1 = sshll.u32 %s1530_s11, 4  ;;  %s45_s10 = int_to_ptr.vmem [resolvable:$true] %s44_s10  ;;  %s57_s1 = int_to_ptr.vmem [resolvable:$true] %s56_s1 }
  0x1b   :  { %s1443_s12 = scalar_lea.vmem %s45_s10, 2048  ;;  %p1448_p11 = scmp.lt.s32.totalorder %s45_s10, %s45_s10 }
  0x1c   :  { %p1444_p10 = scmp.ne.s32.totalorder %s45_s10, %s1443_s12  ;;  %p1449_p12 = scmp.lt.s32.totalorder %s1443_s12, %s1443_s12 }
  0x1e   :  { %p1450_p13 = por %p1449_p12, %p1448_p11 }
  0x20   :  { %p1451_p0 = pnand %p1450_p13, %p1444_p10 }
  0x22   :  { %1454 = shalt.err (!%p1451_p0)
}
  0x23   :  { %50 = dma.hbm_to_vmem [thread:$0]  %s1929_s2, 2048, %s45_s10, [#allocation7], %s1527_s29, %s1527_s29, %s1528_s30  }
  0x24   :  { %s1463_s0 = scalar_lea.vmem %s57_s1, 2048  ;;  %p1468_p2 = scmp.lt.s32.totalorder %s57_s1, %s57_s1 }
  0x25   :  { %p1464_p1 = scmp.ne.s32.totalorder %s57_s1, %s1463_s0  ;;  %p1469_p3 = scmp.lt.s32.totalorder %s1463_s0, %s1463_s0 }
  0x27   :  { %p1470_p4 = por %p1469_p3, %p1468_p2 }
  0x29   :  { %p1471_p5 = pnand %p1470_p4, %p1464_p1 }
  0x2b   :  { %1474 = shalt.err (!%p1471_p5)
}
  0x2c   :  { %62 = dma.hbm_to_vmem [thread:$0]  %s1930_s3, 2048, %s57_s1, [#allocation10], %s1527_s29, %s1527_s29, %s1528_s30  }
  0x2d   :  { %1515 = dma.done.wait [#allocation4], 1024  }
  0x2e   :  { %1516 = vsyncadd [#allocation4], 4294966272 }
  0x2f   :  { %1517 = dma.done.wait [#allocation7], 2176  }
  0x30   :  { %1518 = vsyncadd [#allocation7], 4294965120 }
  0x31   :  { %1519 = dma.done.wait [#allocation10], 2048  }
  0x32   :  { %1520 = vsyncadd [#allocation10], 4294965248  ;;  %v1531_v0 = vmov 0.0   ;;  %vm1532_vm0 = vmmov 0   ;;  %v1597_v1 = vld [vmem:[#allocation8 + $0x78] sm:$0xff]  ;;  %v1599_v2 = vld [vmem:[#allocation8 + $0x70] sm:$0xff] }
  0x33   :  { %1045 = vmatprep.subr.mxu1 %v1531_v0  ;;  %1077 = vmatprep.mubr.msk.f32.mxu1 %vm1532_vm0, %v1531_v0  ;;  %v1604_v3 = vld [vmem:[#allocation8 + $0x68] sm:$0xff]  ;;  %v1610_v4 = vld [vmem:[#allocation8 + $0x60] sm:$0xff]  ;;  %v1616_v5 = vld [vmem:[#allocation8 + $0x58] sm:$0xff] }
  0x34   :  { %1115 = vmatprep.subr.mxu0 %v1531_v0  ;;  %1147 = vmatprep.mubr.msk.f32.mxu0 %vm1532_vm0, %v1531_v0  ;;  %v1622_v6 = vld [vmem:[#allocation8 + $0x50] sm:$0xff]  ;;  %v1628_v7 = vld [vmem:[#allocation8 + $0x48] sm:$0xff]  ;;  %v1634_v8 = vld [vmem:[#allocation8 + $0x40] sm:$0xff] }
  0x35   :  { %1046 = vmatpush3.msra.mxu1 %v1597_v1  ;;  %1116 = vmatpush3.msra.mxu0 %v1597_v1  ;;  %v1640_v9 = vld [vmem:[#allocation8 + $0x38] sm:$0xff]  ;;  %v1646_v10 = vld [vmem:[#allocation8 + $0x30] sm:$0xff]  ;;  %v1652_v11 = vld [vmem:[#allocation8 + $0x28] sm:$0xff] }
  0x36   :  { %1047 = vmatprep.subr.mxu1 %v1531_v0  ;;  %1117 = vmatprep.subr.mxu0 %v1531_v0  ;;  %v1658_v12 = vld [vmem:[#allocation8 + $0x20] sm:$0xff]  ;;  %v1664_v13 = vld [vmem:[#allocation8 + $0x18] sm:$0xff]  ;;  %v1670_v14 = vld [vmem:[#allocation8 + $0x10] sm:$0xff] }
  0x37   :  { %1048 = vmatpush3.msra.mxu1 %v1599_v2  ;;  %1118 = vmatpush3.msra.mxu0 %v1599_v2  ;;  %v1676_v15 = vld [vmem:[#allocation8 + $0x8] sm:$0xff]  ;;  %v1682_v16 = vld [vmem:[#allocation8] sm:$0xff]  ;;  %v81_v17 = vld [vmem:[#allocation6] sm:$0xff] }
  0x38   :  { %1049 = vmatprep.subr.mxu1 %v1531_v0  ;;  %1119 = vmatprep.subr.mxu0 %v1531_v0  ;;  %v100_v18 = vld [vmem:[#allocation3] sm:$0xff]  ;;  %v175_v23 = vld [vmem:[#allocation3 + $0x8] sm:$0xff]  ;;  %v251_v28 = vld [vmem:[#allocation3 + $0x10] sm:$0xff] }
  0x39   :  { %1050 = vmatpush3.msra.mxu1 %v1604_v3  ;;  %1120 = vmatpush3.msra.mxu0 %v1604_v3  ;;  %v327_v33 = vld [vmem:[#allocation3 + $0x18] sm:$0xff]  ;;  %v403_v38 = vld [vmem:[#allocation3 + $0x20] sm:$0xff]  ;;  %v479_v44 = vld [vmem:[#allocation3 + $0x28] sm:$0xff] }
  0x3a   :  { %1051 = vmatprep.subr.mxu1 %v1531_v0  ;;  %1121 = vmatprep.subr.mxu0 %v1531_v0  ;;  %v722_v43 = vld [vmem:[#allocation9 + $0x78] sm:$0xff]  ;;  %v721_v49 = vld [vmem:[#allocation9 + $0x70] sm:$0xff]  ;;  %v720_v50 = vld [vmem:[#allocation9 + $0x68] sm:$0xff] }
  0x3b   :  { %1052 = vmatpush3.msra.mxu1 %v1610_v4  ;;  %1122 = vmatpush3.msra.mxu0 %v1610_v4  ;;  %v719_v51 = vld [vmem:[#allocation9 + $0x60] sm:$0xff]  ;;  %v718_v52 = vld [vmem:[#allocation9 + $0x58] sm:$0xff]  ;;  %v717_v53 = vld [vmem:[#allocation9 + $0x50] sm:$0xff] }
  0x3c   :  { %1053 = vmatprep.subr.mxu1 %v1531_v0  ;;  %1123 = vmatprep.subr.mxu0 %v1531_v0  ;;  %v716_v54 = vld [vmem:[#allocation9 + $0x48] sm:$0xff]  ;;  %v715_v55 = vld [vmem:[#allocation9 + $0x40] sm:$0xff]  ;;  %v714_v56 = vld [vmem:[#allocation9 + $0x38] sm:$0xff] }
  0x3d   :  { %1054 = vmatpush3.msra.mxu1 %v1616_v5  ;;  %1124 = vmatpush3.msra.mxu0 %v1616_v5  ;;  %v713_v57 = vld [vmem:[#allocation9 + $0x30] sm:$0xff]  ;;  %v712_v58 = vld [vmem:[#allocation9 + $0x28] sm:$0xff]  ;;  %v711_v59 = vld [vmem:[#allocation9 + $0x20] sm:$0xff] }
  0x3e   :  { %1055 = vmatprep.subr.mxu1 %v1531_v0  ;;  %1125 = vmatprep.subr.mxu0 %v1531_v0  ;;  %v710_v60 = vld [vmem:[#allocation9 + $0x18] sm:$0xff]  ;;  %v709_v61 = vld [vmem:[#allocation9 + $0x10] sm:$0xff]  ;;  %v708_v62 = vld [vmem:[#allocation9 + $0x8] sm:$0xff] }
  0x3f   :  { %1056 = vmatpush3.msra.mxu1 %v1622_v6  ;;  %1126 = vmatpush3.msra.mxu0 %v1622_v6  ;;  %v707_v63 = vld [vmem:[#allocation9] sm:$0xff] }
  0x40   :  { %1057 = vmatprep.subr.mxu1 %v1531_v0  ;;  %1127 = vmatprep.subr.mxu0 %v1531_v0 }
  0x41   :  { %1058 = vmatpush3.msra.mxu1 %v1628_v7  ;;  %1128 = vmatpush3.msra.mxu0 %v1628_v7 }
  0x42   :  { %1059 = vmatprep.subr.mxu1 %v1531_v0  ;;  %1129 = vmatprep.subr.mxu0 %v1531_v0 }
  0x43   :  { %1060 = vmatpush3.msra.mxu1 %v1634_v8  ;;  %1130 = vmatpush3.msra.mxu0 %v1634_v8 }
  0x44   :  { %1061 = vmatprep.subr.mxu1 %v1531_v0  ;;  %1131 = vmatprep.subr.mxu0 %v1531_v0 }
  0x45   :  { %1062 = vmatpush3.msra.mxu1 %v1640_v9  ;;  %1132 = vmatpush3.msra.mxu0 %v1640_v9 }
  0x46   :  { %1063 = vmatprep.subr.mxu1 %v1531_v0  ;;  %1133 = vmatprep.subr.mxu0 %v1531_v0 }
  0x47   :  { %1064 = vmatpush3.msra.mxu1 %v1646_v10  ;;  %1134 = vmatpush3.msra.mxu0 %v1646_v10 }
  0x48   :  { %1065 = vmatprep.subr.mxu1 %v1531_v0  ;;  %1135 = vmatprep.subr.mxu0 %v1531_v0 }
  0x49   :  { %1066 = vmatpush3.msra.mxu1 %v1652_v11  ;;  %1136 = vmatpush3.msra.mxu0 %v1652_v11 }
  0x4a   :  { %1067 = vmatprep.subr.mxu1 %v1531_v0  ;;  %1137 = vmatprep.subr.mxu0 %v1531_v0 }
  0x4b   :  { %1068 = vmatpush3.msra.mxu1 %v1658_v12  ;;  %1138 = vmatpush3.msra.mxu0 %v1658_v12 }
  0x4c   :  { %1069 = vmatprep.subr.mxu1 %v1531_v0  ;;  %1139 = vmatprep.subr.mxu0 %v1531_v0 }
  0x4d   :  { %1070 = vmatpush3.msra.mxu1 %v1664_v13  ;;  %1140 = vmatpush3.msra.mxu0 %v1664_v13 }
  0x4e   :  { %1071 = vmatprep.subr.mxu1 %v1531_v0  ;;  %1141 = vmatprep.subr.mxu0 %v1531_v0 }
  0x4f   :  { %1072 = vmatpush3.msra.mxu1 %v1670_v14  ;;  %1142 = vmatpush3.msra.mxu0 %v1670_v14 }
  0x50   :  { %1073 = vmatprep.subr.mxu1 %v1531_v0  ;;  %1143 = vmatprep.subr.mxu0 %v1531_v0 }
  0x51   :  { %1074 = vmatpush3.msra.mxu1 %v1676_v15  ;;  %1144 = vmatpush3.msra.mxu0 %v1676_v15 }
  0x52   :  { %1075 = vmatprep.subr.mxu1 %v1531_v0  ;;  %1145 = vmatprep.subr.mxu0 %v1531_v0 }
  0x53   :  { %1076 = vmatpush3.msra.mxu1 %v1682_v16  ;;  %1146 = vmatpush3.msra.mxu0 %v1682_v16 }
  0x54   :  { %1078 = vmatmul.mubr.f32.vlgmr.msra.gmra.mxu1 %v81_v17  ;;  %1080 = vmatprep.subr.mxu1 %v1531_v0 }
  0x55   :  { %1081 = vmatpush3.msra.mxu1 %v1597_v1  ;;  %1112 = vmatprep.mubr.msk.f32.mxu1 %vm1532_vm0, %v1531_v0 }
  0x56   :  { %1082 = vmatprep.subr.mxu1 %v1531_v0  ;;  %1185 = vmatprep.subr.mxu0 %v1531_v0 }
  0x57   :  { %1083 = vmatpush3.msra.mxu1 %v1599_v2 }
  0x58   :  { %1084 = vmatprep.subr.mxu1 %v1531_v0 }
  0x59   :  { %1085 = vmatpush3.msra.mxu1 %v1604_v3 }
  0x5a   :  { %1086 = vmatprep.subr.mxu1 %v1531_v0 }
  0x5b   :  { %1087 = vmatpush3.msra.mxu1 %v1610_v4 }
  0x5c   :  { %1088 = vmatprep.subr.mxu1 %v1531_v0 }
  0x5d   :  { %1089 = vmatpush3.msra.mxu1 %v1616_v5 }
  0x5e   :  { %1090 = vmatprep.subr.mxu1 %v1531_v0 }
  0x5f   :  { %1091 = vmatpush3.msra.mxu1 %v1622_v6 }
  0x60   :  { %1092 = vmatprep.subr.mxu1 %v1531_v0 }
  0x61   :  { %1093 = vmatpush3.msra.mxu1 %v1628_v7 }
  0x62   :  { %1094 = vmatprep.subr.mxu1 %v1531_v0 }
  0x63   :  { %1095 = vmatpush3.msra.mxu1 %v1634_v8 }
  0x64   :  { %1096 = vmatprep.subr.mxu1 %v1531_v0 }
  0x65   :  { %1097 = vmatpush3.msra.mxu1 %v1640_v9 }
  0x66   :  { %1098 = vmatprep.subr.mxu1 %v1531_v0 }
  0x67   :  { %1099 = vmatpush3.msra.mxu1 %v1646_v10 }
  0x68   :  { %1100 = vmatprep.subr.mxu1 %v1531_v0 }
  0x69   :  { %1101 = vmatpush3.msra.mxu1 %v1652_v11 }
  0x6a   :  { %1102 = vmatprep.subr.mxu1 %v1531_v0 }
  0x6b   :  { %1103 = vmatpush3.msra.mxu1 %v1658_v12 }
  0x6c   :  { %1104 = vmatprep.subr.mxu1 %v1531_v0 }
  0x6d   :  { %1105 = vmatpush3.msra.mxu1 %v1664_v13 }
  0x6e   :  { %1106 = vmatprep.subr.mxu1 %v1531_v0 }
  0x6f   :  { %1107 = vmatpush3.msra.mxu1 %v1670_v14 }
  0x70   :  { %1108 = vmatprep.subr.mxu1 %v1531_v0 }
  0x71   :  { %1109 = vmatpush3.msra.mxu1 %v1676_v15 }
  0x72   :  { %1110 = vmatprep.subr.mxu1 %v1531_v0 }
  0x73   :  { %1111 = vmatpush3.msra.mxu1 %v1682_v16 }
  0x74   :  { %1150 = vmatprep.subr.mxu1 %v1531_v0 }
 0x114   :  { %v167_v19 = vpop.f32.mrf.mxu1 }
 0x115   :  { %v171_v20 = vadd.f32 %v167_v19, %v100_v18  ;;  %v631_v18 = vld [vmem:[#allocation3 + $0x38] sm:$0xff] }
 0x116   :  { %v1079_v21 = vpop.f32.mrf.mxu1 }
 0x117   :  { %1379 = vtanh.f32 %v171_v20 }
 0x124   :  { %v1727_v22 = vpop.eup %1379 }
 0x125   :  { %1113 = vmatmul.mubr.f32.vlgmr.msra.gmra.mxu1 %v1727_v22 }
 0x126   :  { %1151 = vmatpush3.msra.mxu1 %v1597_v1  ;;  %1182 = vmatprep.mubr.msk.f32.mxu1 %vm1532_vm0, %v1531_v0 }
 0x127   :  { %1152 = vmatprep.subr.mxu1 %v1531_v0 }
 0x128   :  { %1153 = vmatpush3.msra.mxu1 %v1599_v2 }
 0x129   :  { %1154 = vmatprep.subr.mxu1 %v1531_v0 }
 0x12a   :  { %1155 = vmatpush3.msra.mxu1 %v1604_v3 }
 0x12b   :  { %1156 = vmatprep.subr.mxu1 %v1531_v0 }
 0x12c   :  { %1157 = vmatpush3.msra.mxu1 %v1610_v4 }
 0x12d   :  { %1158 = vmatprep.subr.mxu1 %v1531_v0 }
 0x12e   :  { %1159 = vmatpush3.msra.mxu1 %v1616_v5 }
 0x12f   :  { %1160 = vmatprep.subr.mxu1 %v1531_v0 }
 0x130   :  { %1161 = vmatpush3.msra.mxu1 %v1622_v6 }
 0x131   :  { %1162 = vmatprep.subr.mxu1 %v1531_v0 }
 0x132   :  { %1163 = vmatpush3.msra.mxu1 %v1628_v7 }
 0x133   :  { %1164 = vmatprep.subr.mxu1 %v1531_v0 }
 0x134   :  { %1165 = vmatpush3.msra.mxu1 %v1634_v8 }
 0x135   :  { %1166 = vmatprep.subr.mxu1 %v1531_v0 }
 0x136   :  { %1167 = vmatpush3.msra.mxu1 %v1640_v9 }
 0x137   :  { %1168 = vmatprep.subr.mxu1 %v1531_v0 }
 0x138   :  { %1169 = vmatpush3.msra.mxu1 %v1646_v10 }
 0x139   :  { %1170 = vmatprep.subr.mxu1 %v1531_v0 }
 0x13a   :  { %1171 = vmatpush3.msra.mxu1 %v1652_v11 }
 0x13b   :  { %1172 = vmatprep.subr.mxu1 %v1531_v0 }
 0x13c   :  { %1173 = vmatpush3.msra.mxu1 %v1658_v12 }
 0x13d   :  { %1174 = vmatprep.subr.mxu1 %v1531_v0 }
 0x13e   :  { %1175 = vmatpush3.msra.mxu1 %v1664_v13 }
 0x13f   :  { %1176 = vmatprep.subr.mxu1 %v1531_v0 }
 0x140   :  { %1177 = vmatpush3.msra.mxu1 %v1670_v14 }
 0x141   :  { %1178 = vmatprep.subr.mxu1 %v1531_v0 }
 0x142   :  { %1179 = vmatpush3.msra.mxu1 %v1676_v15 }
 0x143   :  { %1180 = vmatprep.subr.mxu1 %v1531_v0 }
 0x144   :  { %1181 = vmatpush3.msra.mxu1 %v1682_v16 }
 0x145   :  { %1220 = vmatprep.subr.mxu1 %v1531_v0 }
 0x1e5   :  { %v242_v24 = vpop.f32.mrf.mxu1 }
 0x1e6   :  { %v246_v25 = vadd.f32 %v242_v24, %v175_v23 }
 0x1e7   :  { %v1114_v26 = vpop.f32.mrf.mxu1 }
 0x1e8   :  { %1381 = vtanh.f32 %v246_v25 }
 0x1f5   :  { %v1764_v27 = vpop.eup %1381 }
 0x1f6   :  { %1148 = vmatmul.mubr.f32.vlgmr.msra.gmra.mxu0 %v1764_v27 }
 0x1f7   :  { %1186 = vmatpush3.msra.mxu0 %v1597_v1  ;;  %1217 = vmatprep.mubr.msk.f32.mxu0 %vm1532_vm0, %v1531_v0 }
 0x1f8   :  { %1187 = vmatprep.subr.mxu0 %v1531_v0 }
 0x1f9   :  { %1188 = vmatpush3.msra.mxu0 %v1599_v2 }
 0x1fa   :  { %1189 = vmatprep.subr.mxu0 %v1531_v0 }
 0x1fb   :  { %1190 = vmatpush3.msra.mxu0 %v1604_v3 }
 0x1fc   :  { %1191 = vmatprep.subr.mxu0 %v1531_v0 }
 0x1fd   :  { %1192 = vmatpush3.msra.mxu0 %v1610_v4 }
 0x1fe   :  { %1193 = vmatprep.subr.mxu0 %v1531_v0 }
 0x1ff   :  { %1194 = vmatpush3.msra.mxu0 %v1616_v5 }
 0x200   :  { %1195 = vmatprep.subr.mxu0 %v1531_v0 }
 0x201   :  { %1196 = vmatpush3.msra.mxu0 %v1622_v6 }
 0x202   :  { %1197 = vmatprep.subr.mxu0 %v1531_v0 }
 0x203   :  { %1198 = vmatpush3.msra.mxu0 %v1628_v7 }
 0x204   :  { %1199 = vmatprep.subr.mxu0 %v1531_v0 }
 0x205   :  { %1200 = vmatpush3.msra.mxu0 %v1634_v8 }
 0x206   :  { %1201 = vmatprep.subr.mxu0 %v1531_v0 }
 0x207   :  { %1202 = vmatpush3.msra.mxu0 %v1640_v9 }
 0x208   :  { %1203 = vmatprep.subr.mxu0 %v1531_v0 }
 0x209   :  { %1204 = vmatpush3.msra.mxu0 %v1646_v10 }
 0x20a   :  { %1205 = vmatprep.subr.mxu0 %v1531_v0 }
 0x20b   :  { %1206 = vmatpush3.msra.mxu0 %v1652_v11 }
 0x20c   :  { %1207 = vmatprep.subr.mxu0 %v1531_v0 }
 0x20d   :  { %1208 = vmatpush3.msra.mxu0 %v1658_v12 }
 0x20e   :  { %1209 = vmatprep.subr.mxu0 %v1531_v0 }
 0x20f   :  { %1210 = vmatpush3.msra.mxu0 %v1664_v13 }
 0x210   :  { %1211 = vmatprep.subr.mxu0 %v1531_v0 }
 0x211   :  { %1212 = vmatpush3.msra.mxu0 %v1670_v14 }
 0x212   :  { %1213 = vmatprep.subr.mxu0 %v1531_v0 }
 0x213   :  { %1214 = vmatpush3.msra.mxu0 %v1676_v15 }
 0x214   :  { %1215 = vmatprep.subr.mxu0 %v1531_v0 }
 0x215   :  { %1216 = vmatpush3.msra.mxu0 %v1682_v16 }
 0x216   :  { %1255 = vmatprep.subr.mxu0 %v1531_v0 }
 0x2b6   :  { %v318_v29 = vpop.f32.mrf.mxu0 }
 0x2b7   :  { %v322_v30 = vadd.f32 %v318_v29, %v251_v28 }
 0x2b8   :  { %v1149_v31 = vpop.f32.mrf.mxu0 }
 0x2b9   :  { %1383 = vtanh.f32 %v322_v30 }
 0x2c6   :  { %v1801_v32 = vpop.eup %1383 }
 0x2c7   :  { %1183 = vmatmul.mubr.f32.vlgmr.msra.gmra.mxu1 %v1801_v32 }
 0x2c8   :  { %1221 = vmatpush3.msra.mxu1 %v1597_v1  ;;  %1252 = vmatprep.mubr.msk.f32.mxu1 %vm1532_vm0, %v1531_v0 }
 0x2c9   :  { %1222 = vmatprep.subr.mxu1 %v1531_v0 }
 0x2ca   :  { %1223 = vmatpush3.msra.mxu1 %v1599_v2 }
 0x2cb   :  { %1224 = vmatprep.subr.mxu1 %v1531_v0 }
 0x2cc   :  { %1225 = vmatpush3.msra.mxu1 %v1604_v3 }
 0x2cd   :  { %1226 = vmatprep.subr.mxu1 %v1531_v0 }
 0x2ce   :  { %1227 = vmatpush3.msra.mxu1 %v1610_v4 }
 0x2cf   :  { %1228 = vmatprep.subr.mxu1 %v1531_v0 }
 0x2d0   :  { %1229 = vmatpush3.msra.mxu1 %v1616_v5 }
 0x2d1   :  { %1230 = vmatprep.subr.mxu1 %v1531_v0 }
 0x2d2   :  { %1231 = vmatpush3.msra.mxu1 %v1622_v6 }
 0x2d3   :  { %1232 = vmatprep.subr.mxu1 %v1531_v0 }
 0x2d4   :  { %1233 = vmatpush3.msra.mxu1 %v1628_v7 }
 0x2d5   :  { %1234 = vmatprep.subr.mxu1 %v1531_v0 }
 0x2d6   :  { %1235 = vmatpush3.msra.mxu1 %v1634_v8 }
 0x2d7   :  { %1236 = vmatprep.subr.mxu1 %v1531_v0 }
 0x2d8   :  { %1237 = vmatpush3.msra.mxu1 %v1640_v9 }
 0x2d9   :  { %1238 = vmatprep.subr.mxu1 %v1531_v0 }
 0x2da   :  { %1239 = vmatpush3.msra.mxu1 %v1646_v10 }
 0x2db   :  { %1240 = vmatprep.subr.mxu1 %v1531_v0 }
 0x2dc   :  { %1241 = vmatpush3.msra.mxu1 %v1652_v11 }
 0x2dd   :  { %1242 = vmatprep.subr.mxu1 %v1531_v0 }
 0x2de   :  { %1243 = vmatpush3.msra.mxu1 %v1658_v12 }
 0x2df   :  { %1244 = vmatprep.subr.mxu1 %v1531_v0 }
 0x2e0   :  { %1245 = vmatpush3.msra.mxu1 %v1664_v13 }
 0x2e1   :  { %1246 = vmatprep.subr.mxu1 %v1531_v0 }
 0x2e2   :  { %1247 = vmatpush3.msra.mxu1 %v1670_v14 }
 0x2e3   :  { %1248 = vmatprep.subr.mxu1 %v1531_v0 }
 0x2e4   :  { %1249 = vmatpush3.msra.mxu1 %v1676_v15 }
 0x2e5   :  { %1250 = vmatprep.subr.mxu1 %v1531_v0 }
 0x2e6   :  { %1251 = vmatpush3.msra.mxu1 %v1682_v16 }
 0x2e7   :  { %1290 = vmatprep.subr.mxu1 %v1531_v0 }
 0x387   :  { %v394_v34 = vpop.f32.mrf.mxu1 }
 0x388   :  { %v398_v35 = vadd.f32 %v394_v34, %v327_v33 }
 0x389   :  { %v1184_v36 = vpop.f32.mrf.mxu1 }
 0x38a   :  { %1385 = vtanh.f32 %v398_v35 }
 0x397   :  { %v1838_v37 = vpop.eup %1385 }
 0x398   :  { %1218 = vmatmul.mubr.f32.vlgmr.msra.gmra.mxu0 %v1838_v37 }
 0x399   :  { %1256 = vmatpush3.msra.mxu0 %v1597_v1  ;;  %1287 = vmatprep.mubr.msk.f32.mxu0 %vm1532_vm0, %v1531_v0 }
 0x39a   :  { %1257 = vmatprep.subr.mxu0 %v1531_v0 }
 0x39b   :  { %1258 = vmatpush3.msra.mxu0 %v1599_v2 }
 0x39c   :  { %1259 = vmatprep.subr.mxu0 %v1531_v0 }
 0x39d   :  { %1260 = vmatpush3.msra.mxu0 %v1604_v3 }
 0x39e   :  { %1261 = vmatprep.subr.mxu0 %v1531_v0 }
 0x39f   :  { %1262 = vmatpush3.msra.mxu0 %v1610_v4 }
 0x3a0   :  { %1263 = vmatprep.subr.mxu0 %v1531_v0 }
 0x3a1   :  { %1264 = vmatpush3.msra.mxu0 %v1616_v5 }
 0x3a2   :  { %1265 = vmatprep.subr.mxu0 %v1531_v0 }
 0x3a3   :  { %1266 = vmatpush3.msra.mxu0 %v1622_v6 }
 0x3a4   :  { %1267 = vmatprep.subr.mxu0 %v1531_v0 }
 0x3a5   :  { %1268 = vmatpush3.msra.mxu0 %v1628_v7 }
 0x3a6   :  { %1269 = vmatprep.subr.mxu0 %v1531_v0 }
 0x3a7   :  { %1270 = vmatpush3.msra.mxu0 %v1634_v8 }
 0x3a8   :  { %1271 = vmatprep.subr.mxu0 %v1531_v0 }
 0x3a9   :  { %1272 = vmatpush3.msra.mxu0 %v1640_v9 }
 0x3aa   :  { %1273 = vmatprep.subr.mxu0 %v1531_v0 }
 0x3ab   :  { %1274 = vmatpush3.msra.mxu0 %v1646_v10 }
 0x3ac   :  { %1275 = vmatprep.subr.mxu0 %v1531_v0 }
 0x3ad   :  { %1276 = vmatpush3.msra.mxu0 %v1652_v11 }
 0x3ae   :  { %1277 = vmatprep.subr.mxu0 %v1531_v0 }
 0x3af   :  { %1278 = vmatpush3.msra.mxu0 %v1658_v12 }
 0x3b0   :  { %1279 = vmatprep.subr.mxu0 %v1531_v0 }
 0x3b1   :  { %1280 = vmatpush3.msra.mxu0 %v1664_v13 }
 0x3b2   :  { %1281 = vmatprep.subr.mxu0 %v1531_v0 }
 0x3b3   :  { %1282 = vmatpush3.msra.mxu0 %v1670_v14 }
 0x3b4   :  { %1283 = vmatprep.subr.mxu0 %v1531_v0 }
 0x3b5   :  { %1284 = vmatpush3.msra.mxu0 %v1676_v15 }
 0x3b6   :  { %1285 = vmatprep.subr.mxu0 %v1531_v0 }
 0x3b7   :  { %1286 = vmatpush3.msra.mxu0 %v1682_v16 }
 0x3b8   :  { %1325 = vmatprep.subr.mxu0 %v722_v43 }
 0x458   :  { %v470_v39 = vpop.f32.mrf.mxu0 }
 0x459   :  { %v474_v40 = vadd.f32 %v470_v39, %v403_v38 }
 0x45a   :  { %v1219_v41 = vpop.f32.mrf.mxu0 }
 0x45b   :  { %1387 = vtanh.f32 %v474_v40 }
 0x468   :  { %v1874_v42 = vpop.eup %1387 }
 0x469   :  { %1253 = vmatmul.mubr.f32.vlgmr.msra.gmra.mxu1 %v1874_v42 }
 0x46a   :  { %1291 = vmatpush3.msra.mxu1 %v1597_v1  ;;  %1322 = vmatprep.mubr.msk.f32.mxu1 %vm1532_vm0, %v1531_v0 }
 0x46b   :  { %1292 = vmatprep.subr.mxu1 %v1531_v0 }
 0x46c   :  { %1293 = vmatpush3.msra.mxu1 %v1599_v2 }
 0x46d   :  { %1294 = vmatprep.subr.mxu1 %v1531_v0 }
 0x46e   :  { %1295 = vmatpush3.msra.mxu1 %v1604_v3 }
 0x46f   :  { %1296 = vmatprep.subr.mxu1 %v1531_v0 }
 0x470   :  { %1297 = vmatpush3.msra.mxu1 %v1610_v4 }
 0x471   :  { %1298 = vmatprep.subr.mxu1 %v1531_v0 }
 0x472   :  { %1299 = vmatpush3.msra.mxu1 %v1616_v5  ;;  %v884_v5 = vld [vmem:[%s1931_s4] ss:$0 sm:$0xff]  ;;  %s1533_s4 = smov [#allocation12]  }
 0x473   :  { %1300 = vmatprep.subr.mxu1 %v1531_v0  ;;  %s869_s17 = sshll.u32 %s1533_s4, 4  ;;  %s870_s17 = int_to_ptr.vmem [resolvable:$true] %s869_s17 }
 0x474   :  { %1301 = vmatpush3.msra.mxu1 %v1622_v6  ;;  %s1475_s18 = scalar_lea.vmem %s870_s17, 128  ;;  %p1480_p7 = scmp.lt.s32.totalorder %s870_s17, %s870_s17 }
 0x475   :  { %1302 = vmatprep.subr.mxu1 %v1531_v0  ;;  %p1476_p6 = scmp.ne.s32.totalorder %s870_s17, %s1475_s18  ;;  %p1481_p8 = scmp.lt.s32.totalorder %s1475_s18, %s1475_s18 }
 0x476   :  { %1303 = vmatpush3.msra.mxu1 %v1628_v7 }
 0x477   :  { %1304 = vmatprep.subr.mxu1 %v1531_v0  ;;  %p1482_p9 = por %p1481_p8, %p1480_p7 }
 0x478   :  { %1305 = vmatpush3.msra.mxu1 %v1634_v8 }
 0x479   :  { %1306 = vmatprep.subr.mxu1 %v1531_v0  ;;  %p1483_p10 = pnand %p1482_p9, %p1476_p6 }
 0x47a   :  { %1307 = vmatpush3.msra.mxu1 %v1640_v9 }
 0x47b   :  { %1308 = vmatprep.subr.mxu1 %v1531_v0 }
 0x47c   :  { %1309 = vmatpush3.msra.mxu1 %v1646_v10 }
 0x47d   :  { %1310 = vmatprep.subr.mxu1 %v1531_v0 }
 0x47e   :  { %1311 = vmatpush3.msra.mxu1 %v1652_v11 }
 0x47f   :  { %1312 = vmatprep.subr.mxu1 %v1531_v0 }
 0x480   :  { %1313 = vmatpush3.msra.mxu1 %v1658_v12 }
 0x481   :  { %1314 = vmatprep.subr.mxu1 %v1531_v0 }
 0x482   :  { %1315 = vmatpush3.msra.mxu1 %v1664_v13 }
 0x483   :  { %1316 = vmatprep.subr.mxu1 %v1531_v0 }
 0x484   :  { %1317 = vmatpush3.msra.mxu1 %v1670_v14 }
 0x485   :  { %1318 = vmatprep.subr.mxu1 %v1531_v0 }
 0x486   :  { %1319 = vmatpush3.msra.mxu1 %v1676_v15 }
 0x487   :  { %1320 = vmatprep.subr.mxu1 %v1531_v0  ;;  %v555_v0 = vld [vmem:[#allocation3 + $0x30] sm:$0xff] }
 0x488   :  { %1321 = vmatpush3.msra.mxu1 %v1682_v16 }
 0x529   :  { %v546_v45 = vpop.f32.mrf.mxu1 }
 0x52a   :  { %v550_v46 = vadd.f32 %v546_v45, %v479_v44 }
 0x52b   :  { %v1254_v47 = vpop.f32.mrf.mxu1 }
 0x52c   :  { %1389 = vtanh.f32 %v550_v46 }
 0x539   :  { %v1390_v48 = vpop.eup %1389 }
 0x53a   :  { %1288 = vmatmul.mubr.f32.vlgmr.msra.gmra.mxu0 %v1390_v48 }
 0x53b   :  { %1326 = vmatpush3.msra.mxu0 %v722_v43  ;;  %1357 = vmatprep.mubr.f32.mxu0 %v1727_v22 }
 0x53c   :  { %1327 = vmatprep.subr.mxu0 %v721_v49 }
 0x53d   :  { %1328 = vmatpush3.msra.mxu0 %v721_v49 }
 0x53e   :  { %1329 = vmatprep.subr.mxu0 %v720_v50 }
 0x53f   :  { %1330 = vmatpush3.msra.mxu0 %v720_v50 }
 0x540   :  { %1331 = vmatprep.subr.mxu0 %v719_v51 }
 0x541   :  { %1332 = vmatpush3.msra.mxu0 %v719_v51 }
 0x542   :  { %1333 = vmatprep.subr.mxu0 %v718_v52 }
 0x543   :  { %1334 = vmatpush3.msra.mxu0 %v718_v52 }
 0x544   :  { %1335 = vmatprep.subr.mxu0 %v717_v53 }
 0x545   :  { %1336 = vmatpush3.msra.mxu0 %v717_v53 }
 0x546   :  { %1337 = vmatprep.subr.mxu0 %v716_v54 }
 0x547   :  { %1338 = vmatpush3.msra.mxu0 %v716_v54 }
 0x548   :  { %1339 = vmatprep.subr.mxu0 %v715_v55 }
 0x549   :  { %1340 = vmatpush3.msra.mxu0 %v715_v55 }
 0x54a   :  { %1341 = vmatprep.subr.mxu0 %v714_v56 }
 0x54b   :  { %1342 = vmatpush3.msra.mxu0 %v714_v56 }
 0x54c   :  { %1343 = vmatprep.subr.mxu0 %v713_v57 }
 0x54d   :  { %1344 = vmatpush3.msra.mxu0 %v713_v57 }
 0x54e   :  { %1345 = vmatprep.subr.mxu0 %v712_v58 }
 0x54f   :  { %1346 = vmatpush3.msra.mxu0 %v712_v58 }
 0x550   :  { %1347 = vmatprep.subr.mxu0 %v711_v59 }
 0x551   :  { %1348 = vmatpush3.msra.mxu0 %v711_v59 }
 0x552   :  { %1349 = vmatprep.subr.mxu0 %v710_v60 }
 0x553   :  { %1350 = vmatpush3.msra.mxu0 %v710_v60 }
 0x554   :  { %1351 = vmatprep.subr.mxu0 %v709_v61 }
 0x555   :  { %1352 = vmatpush3.msra.mxu0 %v709_v61 }
 0x556   :  { %1353 = vmatprep.subr.mxu0 %v708_v62 }
 0x557   :  { %1354 = vmatpush3.msra.mxu0 %v708_v62 }
 0x558   :  { %1355 = vmatprep.subr.mxu0 %v707_v63 }
 0x559   :  { %1356 = vmatpush3.msra.mxu0 %v707_v63 }
 0x55a   :  { %1358 = vmatmul.mubr.f32.vlgmr.msra.gmra.mxu0 %v1764_v27 }
 0x55b   :  { %1360 = vmatprep.mubr.f32.mxu0 %v1801_v32 }
 0x55e   :  { %1361 = vmatmul.mubr.f32.gmra.mxu0 %v1838_v37 }
 0x55f   :  { %1363 = vmatprep.mubr.f32.mxu0 %v1874_v42 }
 0x562   :  { %1364 = vmatmul.mubr.f32.gmra.mxu0 %v1390_v48 }
 0x5fa   :  { %v622_v1 = vpop.f32.mrf.mxu0 }
 0x5fb   :  { %v626_v2 = vadd.f32 %v622_v1, %v555_v0 }
 0x5fc   :  { %v1289_v3 = vpop.f32.mrf.mxu0 }
 0x5fd   :  { %1391 = vtanh.f32 %v626_v2 }
 0x60a   :  { %v1392_v4 = vpop.eup %1391 }
 0x60b   :  { %1323 = vmatmul.mubr.f32.vlgmr.msra.gmra.mxu1 %v1392_v4  ;;  %1366 = vmatprep.mubr.f32.mxu0 %v1392_v4 }
 0x61a   :  { %v1359_v6 = vpop.f32.mrf.mxu0 }
 0x61b   :  { %v810_v7 = vadd.f32 %v1359_v6, %v884_v5 }
 0x61c   :  { %v804_v8 = vpop.f32.mrf.mxu0 }
 0x61d   :  { %844 = vst [vmem:[#allocation11 + $0x8] sm:$0xff] %v810_v7  ;;  %v805_v9 = vadd.f32 %v884_v5, %v804_v8 }
 0x61e   :  { %v1362_v10 = vpop.f32.mrf.mxu0 }
 0x61f   :  { %843 = vst [vmem:[#allocation11] sm:$0xff] %v805_v9  ;;  %v820_v11 = vadd.f32 %v1362_v10, %v884_v5 }
 0x620   :  { %v814_v12 = vpop.f32.mrf.mxu0 }
 0x621   :  { %846 = vst [vmem:[#allocation11 + $0x18] sm:$0xff] %v820_v11  ;;  %v815_v13 = vadd.f32 %v884_v5, %v814_v12 }
 0x622   :  { %v1365_v14 = vpop.f32.mrf.mxu0 }
 0x623   :  { %845 = vst [vmem:[#allocation11 + $0x10] sm:$0xff] %v815_v13  ;;  %v830_v15 = vadd.f32 %v1365_v14, %v884_v5 }
 0x624   :  { %v824_v16 = vpop.f32.mrf.mxu0 }
 0x625   :  { %848 = vst [vmem:[#allocation11 + $0x28] sm:$0xff] %v830_v15  ;;  %v825_v17 = vadd.f32 %v884_v5, %v824_v16 }
 0x627   :  { %847 = vst [vmem:[#allocation11 + $0x20] sm:$0xff] %v825_v17 }
 0x6cb   :  { %v698_v19 = vpop.f32.mrf.mxu1 }
 0x6cc   :  { %v702_v20 = vadd.f32 %v698_v19, %v631_v18 }
 0x6cd   :  { %v1324_v21 = vpop.f32.mrf.mxu1 }
 0x6ce   :  { %1393 = vtanh.f32 %v702_v20 }
 0x6db   :  { %v1394_v22 = vpop.eup %1393 }
 0x6dc   :  { %706 = vst [vmem:[#allocation12] sm:$0xff] %v1394_v22  ;;  %1367 = vmatmul.mubr.f32.gmra.mxu0 %v1394_v22 }
 0x6dd   :  { %1486 = shalt.err (!%p1483_p10)
}
 0x6de   :  { %872 = dma.vmem_to_hbm [thread:$0]  %s870_s17, 128, %s1933_s6, [#allocation13]  }
 0x6df   :  { %s1534_s21 = smov [#allocation11]  }
 0x6e0   :  { %s856_s22 = sshll.u32 %s1534_s21, 4  ;;  %s857_s22 = int_to_ptr.vmem [resolvable:$true] %s856_s22 }
 0x6e1   :  { %s1495_s23 = scalar_lea.vmem %s857_s22, 1024  ;;  %p1500_p12 = scmp.lt.s32.totalorder %s857_s22, %s857_s22 }
 0x6e2   :  { %p1496_p11 = scmp.ne.s32.totalorder %s857_s22, %s1495_s23  ;;  %p1501_p13 = scmp.lt.s32.totalorder %s1495_s23, %s1495_s23 }
 0x6e4   :  { %p1502_p0 = por %p1501_p13, %p1500_p12 }
 0x6e6   :  { %p1503_p1 = pnand %p1502_p0, %p1496_p11 }
 0x79c   :  { %v1368_v23 = vpop.f32.mrf.mxu0 }
 0x79d   :  { %v840_v24 = vadd.f32 %v1368_v23, %v884_v5 }
 0x79e   :  { %v834_v25 = vpop.f32.mrf.mxu0 }
 0x79f   :  { %850 = vst [vmem:[#allocation11 + $0x38] sm:$0xff] %v840_v24  ;;  %v835_v26 = vadd.f32 %v884_v5, %v834_v25 }
 0x7a1   :  { %849 = vst [vmem:[#allocation11 + $0x30] sm:$0xff] %v835_v26 }
 0x7a2   :  { %1506 = shalt.err (!%p1503_p1)
}
 0x7a3   :  { %862 = dma.vmem_to_hbm [thread:$0]  %s857_s22, 1024, %s1932_s5, [#allocation5], %s1527_s29, %s1527_s29, %s1528_s30  }
 0x7a4   :  { %1521 = dma.done.wait [#allocation5], 1024  }
 0x7a5   :  { %1522 = vsyncadd [#allocation5], 4294966272 }
 0x7a6   :  { %1523 = dma.done.wait [#allocation13], 128  }
 0x7a7   :  { %1524 = vsyncadd [#allocation13], 4294967168 }
 0x7a8   :  { %879 = vsyncpa [#allocation4], 1 }
 0x7a9   :  { %880 = vsyncpa [#allocation7], 1 }
 0x7aa   :  { %881 = vsyncpa [#allocation10], 1 }
 0x7ab   :  { %882 = vsyncpa [#allocation5], 1 }
 0x7ac   :  { %883 = vsyncpa [#allocation13], 1 }

</bundles_post_ra>
